<compile_context>
chip_gen: v7x
topology: tpu7x:2x2x1
jax: 0.10.0
libtpu: 0.0.40
codegen_flags: <defaults>
</compile_context>

<pallas_src>
import jax
import jax.numpy as jnp
from jax.experimental import pallas as pl
from jax.experimental.pallas import tpu as pltpu

_LANE = 128
_MAX_COLS = 1024               # lane-dense slab width cap (8 full f32 vregs per row)
_TARGET_BLOCK_BYTES = 8 << 20  # ~8 MiB per block; x2 (in+out) x2 (double-buffer) = 32 MiB
_VMEM_LIMIT_BYTES = 48 << 20   # fits v7x's 64 MiB physical VMEM; ample on v5e/v6e


def _round_up(x, m):
    return (x + m - 1) // m * m


def _choose_cols(n):
    """Largest multiple of 128 that divides n and is <= _MAX_COLS (else None)."""
    for c in range(_MAX_COLS, 0, -_LANE):
        if n % c == 0:
            return c
    return None


def _choose_block_rows(rows, cols, itemsize):
    """~_TARGET_BLOCK_BYTES per block (dtype-scaled), multiple of 8 (or full dim),
    and >=2 blocks for mid/large slabs so v7x's two TensorCores both get work."""
    target = max(8, (_TARGET_BLOCK_BYTES // (cols * itemsize)) // 8 * 8)
    block_rows = rows if rows <= target else target
    if pl.cdiv(rows, block_rows) == 1 and rows >= 16:
        block_rows = _round_up(pl.cdiv(rows, 2), 8)   # megacore split (v7x)
    return block_rows


def _apply_elementwise(f, x):
    """Apply an elementwise callable f to x via a tiled, pipelined Pallas kernel."""
    out_aval = jax.eval_shape(f, jax.ShapeDtypeStruct(x.shape, x.dtype))
    # Kernel path only supports per-element (shape-preserving, no cross-element
    # dependence) callables; softmax/layernorm-style f must NOT take this path.
    assert out_aval.shape == x.shape, "Pallas path requires an elementwise f"
    out_dtype = out_aval.dtype

    n = x.size
    itemsize = max(jnp.dtype(x.dtype).itemsize, jnp.dtype(out_dtype).itemsize)

    cols = _choose_cols(n)
    if cols is not None:
        # Reshape-only slab (free metadata op): no pad, no tail slice.
        pad = 0
        rows = n // cols
        slab = x.reshape(rows, cols)
    else:
        # TODO(synk): sizes with no 128-multiple factorization fall back to
        # pad + tail-slice (two extra HBM passes outside the kernel).
        cols = min(_MAX_COLS, _LANE * pl.cdiv(n, _LANE))
        rows = pl.cdiv(n, cols)
        pad = rows * cols - n
        slab = jnp.pad(x.reshape(-1), (0, pad)).reshape(rows, cols)

    block_rows = _choose_block_rows(rows, cols, itemsize)
    grid = (pl.cdiv(rows, block_rows),)   # ragged last block is masked by Pallas

    def kernel(x_ref, o_ref):
        # Whole tile in VMEM; elementwise f runs on the VPU/EUP and is free
        # filler under this mem-bound streaming copy.
        o_ref[...] = f(x_ref[...]).astype(o_ref.dtype)

    # Alias only when the slab is a fresh intermediate (pad path); aliasing a
    # reshape-view of the caller's live x forces a defensive XLA copy.
    aliases = {0: 0} if (pad > 0 and out_dtype == x.dtype) else {}

    out2d = pl.pallas_call(
        kernel,
        out_shape=jax.ShapeDtypeStruct((rows, cols), out_dtype),
        grid_spec=pl.GridSpec(
            grid=grid,
            in_specs=[pl.BlockSpec((block_rows, cols), lambda i: (i, 0))],
            out_specs=pl.BlockSpec((block_rows, cols), lambda i: (i, 0)),
        ),
        compiler_params=pltpu.CompilerParams(
            dimension_semantics=("parallel",),
            vmem_limit_bytes=_VMEM_LIMIT_BYTES,
        ),
        input_output_aliases=aliases,
    )(slab)

    if pad:
        return out2d.reshape(-1)[:n].reshape(x.shape)
    return out2d.reshape(x.shape)


def identity_module(f=None):
    """Returns a callable equivalent to Identity(f).forward.

    f=None (the identity) is short-circuited: the input is returned as-is
    (zero HBM traffic).  Pass force_kernel=True to exercise the Pallas path.
    """
    is_identity = f is None
    if is_identity:
        f = lambda t: t

    def forward(x, *, force_kernel=False):
        if is_identity and not force_kernel:
            # Fast path: a kernel here would only add 2x tensor-size HBM traffic.
            return x
        return _apply_elementwise(f, x)

    return forward


if __name__ == "__main__":
    key = jax.random.PRNGKey(0)
    # NCHW input consistent with a resnet-style module: batch=2, C=4, H=W=16.
    x = jax.random.normal(key, (2, 4, 16, 16), dtype=jnp.float32)

    # 1) True identity: short-circuited, no kernel launch.
    ident = identity_module()
    y = jax.block_until_ready(ident(x))
    assert y.shape == x.shape and y.dtype == x.dtype
    assert bool(jnp.all(y == x))

    # 2) Forced Pallas path for identity: reshape-only slab 2048 -> (2, 1024),
    #    no pad, no slice.
    y_k = jax.block_until_ready(ident(x, force_kernel=True))
    assert y_k.shape == x.shape and y_k.dtype == x.dtype
    assert bool(jnp.all(y_k == x))

    # 3) Non-trivial elementwise f fused into the kernel (ReLU).
    relu_wrap = identity_module(lambda t: jnp.maximum(t, 0.0))
    y2 = jax.block_until_ready(relu_wrap(x))
    assert bool(jnp.allclose(y2, jnp.maximum(x, 0.0)))

    # 4) bf16 slab exercising a >=2-block "parallel" grid (v7x megacore split).
    xb = jax.random.normal(key, (32, 8, 128), dtype=jnp.bfloat16)
    gelu_wrap = identity_module(jax.nn.gelu)
    yb = jax.block_until_ready(gelu_wrap(xb))
    assert yb.shape == xb.shape
    assert bool(jnp.allclose(yb, jax.nn.gelu(xb), atol=2e-2, rtol=2e-2))

    # 5) Ragged last block: 20 rows tiled by block_rows=16 (masked tail block).
    xr = jax.random.normal(key, (20, 1024), dtype=jnp.float32)
    yr = jax.block_until_ready(identity_module()(xr, force_kernel=True))
    assert bool(jnp.all(yr == xr))

    # 6) Unaligned size (105 elements): pad + slice fallback path.
    xo = jax.random.normal(key, (3, 5, 7), dtype=jnp.float32)
    yo = jax.block_until_ready(relu_wrap(xo))
    assert bool(jnp.allclose(yo, jnp.maximum(xo, 0.0)))

    # TODO(synk): non-elementwise f (reductions / shape-changing callables) has
    # no generic Pallas translation here; it would need its own layout-aware
    # BlockSpec instead of this flat lane-dense streaming copy.

    print("KERNEL_OK")
</pallas_src>

<mosaic_0001>
module attributes {stable_mosaic.version = 11 : i64} {
  func.func @kernel(%arg0: i32, %arg1: memref<2x1024xf32, #tpu.memory_space<vmem>>, %arg2: memref<2x1024xf32, #tpu.memory_space<vmem>>) attributes {dimension_semantics = [#tpu.dimension_semantics<parallel>], iteration_bounds = array<i64: 1>, scalar_prefetch = 0 : i64, scratch_operands = 0 : i64, tpu.core_type = #tpu.core_type<tc>, window_params = [{transform_indices = @transform_0, window_bounds = array<i64: 2, 1024>}, {transform_indices = @transform_1, window_bounds = array<i64: 2, 1024>}]} {
    %c0 = arith.constant 0 : index
    %c0_0 = arith.constant 0 : index
    %0 = vector.load %arg1[%c0, %c0_0] : memref<2x1024xf32, #tpu.memory_space<vmem>>, vector<2x1024xf32>
    %c0_1 = arith.constant 0 : index
    %c0_2 = arith.constant 0 : index
    %1 = vector.load %arg2[%c0_1, %c0_2] : memref<2x1024xf32, #tpu.memory_space<vmem>>, vector<2x1024xf32>
    tpu.vector_store %arg2[%c0_1, %c0_2], %0 {strides = array<i32>} : memref<2x1024xf32, #tpu.memory_space<vmem>>, vector<2x1024xf32>,
    return
  }
  func.func @transform_0(%arg0: i32) -> (i32, i32) {
    %c0_i32 = arith.constant 0 : i32
    %c0_i32_0 = arith.constant 0 : i32
    return %arg0, %c0_i32 : i32, i32
  }
  func.func @transform_1(%arg0: i32) -> (i32, i32) {
    %c0_i32 = arith.constant 0 : i32
    %c0_i32_0 = arith.constant 0 : i32
    return %arg0, %c0_i32 : i32, i32
  }
}

</mosaic_0001>

<bundles_post_ra>
// kernel: tpu_custom_call.1
= control target key start
LH: loop header
LB: loop body
LE: loop exit
PB: predicated region body
PF: predicated region fallthrough
CT: control target
= control target key end

     0   :  { %6 = vsyncpa [#allocation3], 0  ;;  %s126_s0 = inlined_call_operand.hbm [shape: f32[2,1024], index: 0, kind: input, shape index: {}]   ;;  %s127_s1 = inlined_call_operand.hbm [shape: f32[2,1024], index: 1, kind: output, shape index: {}]  }
   0x1   :  { %7 = vsyncpa [#allocation4], 0  ;;  %s90_s6 = smov [#allocation2]   ;;  %s42_s10 = scalar_lea.hbm %s126_s0, 256 }
   0x2   :  { %s14_s7 = sshll.u32 %s90_s6, 4  ;;  %p43_p0 = scmp.ne.s32.totalorder %s126_s0, %s42_s10  ;;  %s15_s7 = int_to_ptr.vmem [resolvable:$true] %s14_s7 }
   0x3   :  { %p46_p1 = scmp.lt.u32.totalorder %s42_s10, %s126_s0 }
   0x5   :  { %p48_p2 = pnand %p46_p1, %p43_p0 }
   0x7   :  { %51 = shalt.err (!%p48_p2)
}
   0x8   :  { %s52_s15 = scalar_lea.vmem %s15_s7, 256  ;;  %p57_p4 = scmp.lt.s32.totalorder %s15_s7, %s15_s7 }
   0x9   :  { %p53_p3 = scmp.ne.s32.totalorder %s15_s7, %s52_s15  ;;  %p58_p5 = scmp.lt.s32.totalorder %s52_s15, %s52_s15 }
   0xb   :  { %p59_p6 = por %p58_p5, %p57_p4 }
   0xd   :  { %p60_p7 = pnand %p59_p6, %p53_p3 }
   0xf   :  { %63 = shalt.err (!%p60_p7)
}
  0x10   :  { %17 = dma.hbm_to_vmem [thread:$0]  %s126_s0, 256, %s15_s7, [#allocation3]  }
  0x11   :  { %86 = dma.done.wait [#allocation3], 256  }
  0x12   :  { %87 = vsyncadd [#allocation3], 4294967040  ;;  %s91_s18 = smov [#allocation5]   ;;  %v21_v0 = vld [vmem:[#allocation2] sm:$0xff]  ;;  %v22_v1 = vld [vmem:[#allocation2 + $0x8] sm:$0xff] }
  0x13   :  { %s31_s19 = sshll.u32 %s91_s18, 4  ;;  %23 = vst [vmem:[#allocation5] sm:$0xff] %v21_v0  ;;  %24 = vst [vmem:[#allocation5 + $0x8] sm:$0xff] %v22_v1  ;;  %s32_s19 = int_to_ptr.vmem [resolvable:$true] %s31_s19 }
  0x14   :  { %s64_s20 = scalar_lea.vmem %s32_s19, 256  ;;  %p69_p9 = scmp.lt.s32.totalorder %s32_s19, %s32_s19 }
  0x15   :  { %p65_p8 = scmp.ne.s32.totalorder %s32_s19, %s64_s20  ;;  %p70_p10 = scmp.lt.s32.totalorder %s64_s20, %s64_s20 }
  0x17   :  { %p71_p11 = por %p70_p10, %p69_p9 }
  0x19   :  { %p72_p12 = pnand %p71_p11, %p65_p8 }
  0x1b   :  { %75 = shalt.err (!%p72_p12)
}
  0x1c   :  { %s76_s0 = scalar_lea.hbm %s127_s1, 256 }
  0x1d   :  { %p77_p13 = scmp.ne.s32.totalorder %s127_s1, %s76_s0  ;;  %p80_p0 = scmp.lt.u32.totalorder %s76_s0, %s127_s1 }
  0x1f   :  { %p82_p1 = pnand %p80_p0, %p77_p13 }
  0x21   :  { %85 = shalt.err (!%p82_p1)
}
  0x22   :  { %34 = dma.vmem_to_hbm [thread:$0]  %s32_s19, 256, %s127_s1, [#allocation4]  }
  0x23   :  { %88 = dma.done.wait [#allocation4], 256  }
  0x24   :  { %89 = vsyncadd [#allocation4], 4294967040 }
  0x25   :  { %38 = vsyncpa [#allocation3], 1 }
  0x26   :  { %39 = vsyncpa [#allocation4], 1 }

</bundles_post_ra>
